<compile_context>
chip_gen: v7x
topology: tpu7x:2x2x1
jax: 0.10.0
libtpu: 0.0.40
codegen_flags: <defaults>
</compile_context>

<pallas_src>
import functools
import math

import jax
import jax.numpy as jnp
from jax.experimental import pallas as pl
from jax.experimental.pallas import tpu as pltpu


def _rmsnorm_kernel(x_ref, w_ref, o_ref, *, eps, inv_hidden):
    # x_ref: (block_rows, hidden), w_ref: (1, hidden) f32 resident block.
    xf = x_ref[...].astype(jnp.float32)
    ss = jnp.sum(xf * xf, axis=-1, keepdims=True)        # XLU cross-lane reduce
    inv = jax.lax.rsqrt(ss * inv_hidden + eps)            # EUP, one per row
    o_ref[...] = ((xf * inv) * w_ref[...]).astype(o_ref.dtype)


def _rmsnorm_folded_kernel(x_ref, w_ref, seg_ref, o_ref, *, eps, inv_hidden):
    # Lane-dense variant for hidden < 128: k = 128 // hidden logical rows are
    # folded into the lane dim.  seg_ref is a (P, P) block-diagonal 0/1 matrix;
    # (x*x) @ seg computes each segment's sum-of-squares and broadcasts it back
    # onto that segment's lanes (MXU work, hidden under the DMA roofline).
    xf = x_ref[...].astype(jnp.float32)
    ss = jnp.dot(xf * xf, seg_ref[...], preferred_element_type=jnp.float32)
    inv = jax.lax.rsqrt(ss * inv_hidden + eps)
    o_ref[...] = ((xf * inv) * w_ref[...]).astype(o_ref.dtype)


@functools.lru_cache(maxsize=None)
def _vmem_budget_bytes():
    """~75% of per-core VMEM (v5e/v6e: ~96 MiB, v7x: ~48 MiB)."""
    try:
        cap = int(pltpu.get_tpu_info().vmem_capacity_bytes)
    except Exception:  # no TPU visible / API change: conservative v7x-sized cap
        cap = 64 << 20
    return (cap * 3) // 4


def _pick_block_rows(rows, hidden, itemsize, vmem_budget):
    """Largest aligned row tile whose double-buffered in/out blocks (+ ~2 f32
    intermediate blocks) fit the VMEM budget; keeps >= 2 grid blocks when
    possible so ("parallel",) can shard rows across TensorCores (v7x)."""
    align = 8 if itemsize >= 4 else (16 if itemsize == 2 else 32)
    if rows <= align:
        return rows                                     # single full-extent block
    # bytes per row resident in VMEM: 2x(in) + 2x(out) + ~2x f32 intermediates
    per_row = 4 * hidden * itemsize + 2 * hidden * 4
    budget = max(vmem_budget - (2 << 20), per_row * align)   # headroom
    br = max(align, (budget // per_row) // align * align)
    # keep >= 2 (roughly balanced) blocks for megacore sharding
    half_aligned = ((((rows + 1) // 2) + align - 1) // align) * align
    br = min(br, half_aligned)
    br = min(br, (rows // align) * align)                # ragged edge via cdiv grid
    return max(align, br)


def rmsnorm(x, weight, eps=1e-5, block_rows=None):
    """RMSNorm over the last axis of `x`, scaled by `weight` (shape [hidden])."""
    orig_shape = x.shape
    hidden = int(orig_shape[-1])
    rows = int(math.prod(orig_shape[:-1]))

    # Lane-dense fold for narrow hidden: pack k = 128 // hidden logical rows
    # into the 128-lane dimension (only when rows divide evenly and the folded
    # row count keeps the MXU operand at least 8 sublanes tall).
    fold = 1
    if hidden < 128 and 128 % hidden == 0:
        k = 128 // hidden
        if rows % k == 0 and rows // k >= 8:
            fold = k

    hidden_p = hidden * fold
    rows_p = rows // fold
    x2d = x.reshape(rows_p, hidden_p)

    w_f32 = weight.astype(jnp.float32).reshape(-1)       # cast once, stays f32
    if fold > 1:
        w2d = jnp.tile(w_f32, fold).reshape(1, hidden_p)
        lane = jnp.arange(hidden_p, dtype=jnp.int32)
        seg = (lane[:, None] // hidden == lane[None, :] // hidden).astype(jnp.float32)
    else:
        w2d = w_f32.reshape(1, hidden_p)
        seg = None

    itemsize = jnp.dtype(x.dtype).itemsize
    vmem_budget = _vmem_budget_bytes()
    if block_rows is None:
        block_rows = _pick_block_rows(rows_p, hidden_p, itemsize, vmem_budget)
    block_rows = max(1, min(int(block_rows), rows_p))

    grid = (pl.cdiv(rows_p, block_rows),)

    # VMEM request derived from the chosen tile (2x in + 2x out double-buffered
    # + ~2 f32 intermediate blocks + headroom), capped at ~75% of physical VMEM.
    in_block = block_rows * hidden_p * itemsize
    f32_block = block_rows * hidden_p * 4
    vmem_limit = 4 * in_block + 2 * f32_block + (2 << 20)
    vmem_limit = int(min(max(vmem_limit, 16 << 20), vmem_budget))

    x_spec = pl.BlockSpec((block_rows, hidden_p), lambda i: (i, 0))
    w_spec = pl.BlockSpec((1, hidden_p), lambda i: (0, 0))            # resident
    o_spec = pl.BlockSpec((block_rows, hidden_p), lambda i: (i, 0))

    if fold > 1:
        kernel = functools.partial(_rmsnorm_folded_kernel, eps=float(eps),
                                   inv_hidden=1.0 / float(hidden))
        in_specs = [x_spec, w_spec,
                    pl.BlockSpec((hidden_p, hidden_p), lambda i: (0, 0))]  # resident
        operands = (x2d, w2d, seg)
    else:
        # TODO(synk): for hidden not a multiple of 128 and not dividing 128,
        # stores stay masked; a wrapper-side pad-to-128 would make them dense.
        kernel = functools.partial(_rmsnorm_kernel, eps=float(eps),
                                   inv_hidden=1.0 / float(hidden))
        in_specs = [x_spec, w_spec]
        operands = (x2d, w2d)

    out = pl.pallas_call(
        kernel,
        out_shape=jax.ShapeDtypeStruct((rows_p, hidden_p), x.dtype),
        grid_spec=pltpu.PrefetchScalarGridSpec(
            num_scalar_prefetch=0,
            grid=grid,
            in_specs=in_specs,
            out_specs=o_spec,
        ),
        compiler_params=pltpu.CompilerParams(
            dimension_semantics=("parallel",),   # shard row blocks across TCs (v7x)
            vmem_limit_bytes=vmem_limit,
        ),
    )(*operands)

    return out.reshape(orig_shape)


if __name__ == "__main__":
    key = jax.random.PRNGKey(0)
    batch, seq, hidden = 4, 8, 32
    x = jax.random.normal(key, (batch, seq, hidden), dtype=jnp.float32)

    # deterministic parameter init (matches nn.init.ones_ in the module)
    weight = jnp.ones((hidden,), dtype=jnp.float32)

    def ref_rmsnorm(x, w, eps=1e-5):
        xf = x.astype(jnp.float32)
        ms = jnp.mean(xf * xf, axis=-1, keepdims=True)
        return (w.astype(jnp.float32) * (xf * jax.lax.rsqrt(ms + eps))).astype(x.dtype)

    # 1) lane-dense folded path (hidden=32 -> 4 rows packed into 128 lanes)
    y = rmsnorm(x, weight, eps=1e-5)
    jax.block_until_ready(y)
    assert y.shape == x.shape and y.dtype == x.dtype
    assert jnp.allclose(y, ref_rmsnorm(x, weight), atol=1e-4, rtol=1e-4)

    # 2) rows not divisible by the fold factor -> standard path + ragged last block
    x2 = jax.random.normal(jax.random.PRNGKey(1), (3, 5, hidden), dtype=jnp.float32)
    y2 = rmsnorm(x2, weight, eps=1e-5)
    jax.block_until_ready(y2)
    assert jnp.allclose(y2, ref_rmsnorm(x2, weight), atol=1e-4, rtol=1e-4)

    # 3) multi-block grid on the folded path (>= 2 blocks for 2-TC sharding)
    x3 = jax.random.normal(jax.random.PRNGKey(2), (8, 32, hidden), dtype=jnp.float32)
    y3 = rmsnorm(x3, weight, eps=1e-5)
    jax.block_until_ready(y3)
    assert jnp.allclose(y3, ref_rmsnorm(x3, weight), atol=1e-4, rtol=1e-4)

    # 4) bf16 inputs: f32 reduction / f32 scale / f32 weight, single final cast
    xb = x.astype(jnp.bfloat16)
    yb = rmsnorm(xb, weight, eps=1e-5)
    jax.block_until_ready(yb)
    assert yb.dtype == jnp.bfloat16
    assert jnp.allclose(yb.astype(jnp.float32),
                        ref_rmsnorm(xb, weight).astype(jnp.float32),
                        atol=3e-2, rtol=3e-2)

    print("KERNEL_OK")
</pallas_src>

<mosaic_0001>
module attributes {stable_mosaic.version = 11 : i64} {
  func.func @_rmsnorm_folded_kernel(%arg0: i32, %arg1: memref<8x128xf32, #tpu.memory_space<vmem>>, %arg2: memref<1x128xf32, #tpu.memory_space<vmem>>, %arg3: memref<128x128xf32, #tpu.memory_space<vmem>>, %arg4: memref<8x128xf32, #tpu.memory_space<vmem>>) attributes {dimension_semantics = [#tpu.dimension_semantics<parallel>], iteration_bounds = array<i64: 1>, scalar_prefetch = 0 : i64, scratch_operands = 0 : i64, tpu.core_type = #tpu.core_type<tc>, window_params = [{transform_indices = @transform_0, window_bounds = array<i64: 8, 128>}, {pipeline_mode = #tpu.pipeline_mode<synchronous>, transform_indices = @transform_1, window_bounds = array<i64: 1, 128>}, {pipeline_mode = #tpu.pipeline_mode<synchronous>, transform_indices = @transform_2, window_bounds = array<i64: 128, 128>}, {transform_indices = @transform_3, window_bounds = array<i64: 8, 128>}]} {
    %c0 = arith.constant 0 : index
    %c0_0 = arith.constant 0 : index
    %0 = vector.load %arg1[%c0, %c0_0] : memref<8x128xf32, #tpu.memory_space<vmem>>, vector<8x128xf32>
    %1 = arith.mulf %0, %0 : vector<8x128xf32>
    %c0_1 = arith.constant 0 : index
    %c0_2 = arith.constant 0 : index
    %2 = vector.load %arg3[%c0_1, %c0_2] : memref<128x128xf32, #tpu.memory_space<vmem>>, vector<128x128xf32>
    %cst = arith.constant dense<0.000000e+00> : vector<8x128xf32>
    %3 = tpu.matmul %1, %2, %cst {dimension_numbers = #tpu.dot_dimension_numbers<[1], [0], [0], [1], [0, 0, 1, 1], [], []>} : vector<8x128xf32>, vector<128x128xf32>, vector<8x128xf32> -> vector<8x128xf32>
    %cst_3 = arith.constant 3.125000e-02 : f32
    %4 = vector.broadcast %cst_3 : f32 to vector<8x128xf32>
    %5 = arith.mulf %3, %4 : vector<8x128xf32>
    %cst_4 = arith.constant 9.99999974E-6 : f32
    %6 = vector.broadcast %cst_4 : f32 to vector<8x128xf32>
    %7 = arith.addf %5, %6 : vector<8x128xf32>
    %8 = math.rsqrt %7 : vector<8x128xf32>
    %9 = arith.mulf %0, %8 : vector<8x128xf32>
    %c0_5 = arith.constant 0 : index
    %c0_6 = arith.constant 0 : index
    %10 = vector.load %arg2[%c0_5, %c0_6] : memref<1x128xf32, #tpu.memory_space<vmem>>, vector<1x128xf32>
    %11 = vector.broadcast %10 : vector<1x128xf32> to vector<8x128xf32>
    %12 = arith.mulf %9, %11 : vector<8x128xf32>
    %c0_7 = arith.constant 0 : index
    %c0_8 = arith.constant 0 : index
    %13 = vector.load %arg4[%c0_7, %c0_8] : memref<8x128xf32, #tpu.memory_space<vmem>>, vector<8x128xf32>
    tpu.vector_store %arg4[%c0_7, %c0_8], %12 {strides = array<i32>} : memref<8x128xf32, #tpu.memory_space<vmem>>, vector<8x128xf32>,
    return
  }
  func.func @transform_0(%arg0: i32) -> (i32, i32) {
    %c0_i32 = arith.constant 0 : i32
    %c0_i32_0 = arith.constant 0 : i32
    return %arg0, %c0_i32 : i32, i32
  }
  func.func @transform_1(%arg0: i32) -> (i32, i32) {
    %c0_i32 = arith.constant 0 : i32
    %c0_i32_0 = arith.constant 0 : i32
    %c0_i32_1 = arith.constant 0 : i32
    return %c0_i32, %c0_i32_0 : i32, i32
  }
  func.func @transform_2(%arg0: i32) -> (i32, i32) {
    %c0_i32 = arith.constant 0 : i32
    %c0_i32_0 = arith.constant 0 : i32
    %c0_i32_1 = arith.constant 0 : i32
    return %c0_i32, %c0_i32_0 : i32, i32
  }
  func.func @transform_3(%arg0: i32) -> (i32, i32) {
    %c0_i32 = arith.constant 0 : i32
    %c0_i32_0 = arith.constant 0 : i32
    return %arg0, %c0_i32 : i32, i32
  }
}

</mosaic_0001>

<bundles_post_ra>
// kernel: tpu_custom_call.1
= control target key start
LH: loop header
LB: loop body
LE: loop exit
PB: predicated region body
PF: predicated region fallthrough
CT: control target
= control target key end

     0   :  { %8 = vsyncpa [#allocation3], 0  ;;  %s391_s0 = inlined_call_operand.hbm [shape: f32[8,128], index: 0, kind: input, shape index: {}]   ;;  %s392_s1 = inlined_call_operand.vmem [shape: f32[1,128], index: 1, kind: input, shape index: {}]   ;;  %s393_s2 = inlined_call_operand.hbm [shape: f32[128,128], index: 2, kind: input, shape index: {}]   ;;  %s394_s3 = inlined_call_operand.hbm [shape: f32[8,128], index: 3, kind: output, shape index: {}]  }
   0x1   :  { %9 = vsyncpa [#allocation6], 0 }
   0x2   :  { %10 = vsyncpa [#allocation4], 0  ;;  %s317_s12 = smov [#allocation2]   ;;  %s318_s14 = smov [#allocation5]  }
   0x3   :  { %s17_s13 = sshll.u32 %s317_s12, 4  ;;  %s28_s15 = sshll.u32 %s318_s14, 4  ;;  %s18_s13 = int_to_ptr.vmem [resolvable:$true] %s17_s13  ;;  %s345_s15 = int_to_ptr.vmem [resolvable:$true] %s28_s15 }
   0x4   :  { %s245_s18 = scalar_lea.hbm %s391_s0, 128 }
   0x5   :  { %p246_p0 = scmp.ne.s32.totalorder %s391_s0, %s245_s18  ;;  %p249_p1 = scmp.lt.u32.totalorder %s245_s18, %s391_s0 }
   0x7   :  { %p251_p2 = pnand %p249_p1, %p246_p0 }
   0x9   :  { %254 = shalt.err (!%p251_p2)
}
   0xa   :  { %s255_s23 = scalar_lea.vmem %s18_s13, 128  ;;  %p260_p4 = scmp.lt.s32.totalorder %s18_s13, %s18_s13 }
   0xb   :  { %p256_p3 = scmp.ne.s32.totalorder %s18_s13, %s255_s23  ;;  %p261_p5 = scmp.lt.s32.totalorder %s255_s23, %s255_s23 }
   0xd   :  { %p262_p6 = por %p261_p5, %p260_p4 }
   0xf   :  { %p263_p7 = pnand %p262_p6, %p256_p3 }
  0x11   :  { %266 = shalt.err (!%p263_p7)
}
  0x12   :  { %20 = dma.hbm_to_vmem [thread:$0]  %s391_s0, 128, %s18_s13, [#allocation3]  }
  0x13   :  { %s267_s28 = scalar_lea.hbm %s393_s2, 2048 }
  0x14   :  { %p268_p8 = scmp.ne.s32.totalorder %s393_s2, %s267_s28  ;;  %p271_p9 = scmp.lt.u32.totalorder %s267_s28, %s393_s2 }
  0x16   :  { %p273_p10 = pnand %p271_p9, %p268_p8 }
  0x18   :  { %276 = shalt.err (!%p273_p10)
}
  0x19   :  { %s277_s6 = scalar_lea.vmem %s345_s15, 2048  ;;  %p282_p12 = scmp.lt.s32.totalorder %s345_s15, %s345_s15 }
  0x1a   :  { %p278_p11 = scmp.ne.s32.totalorder %s345_s15, %s277_s6  ;;  %p283_p13 = scmp.lt.s32.totalorder %s277_s6, %s277_s6 }
  0x1c   :  { %p284_p0 = por %p283_p13, %p282_p12 }
  0x1e   :  { %p285_p1 = pnand %p284_p0, %p278_p11 }
  0x20   :  { %288 = shalt.err (!%p285_p1)
}
  0x21   :  { %s319_s0 = smov 128   ;;  %s320_s7 = smov 8  }
  0x22   :  { %34 = dma.hbm_to_vmem [thread:$0]  %s393_s2, 2048, %s345_s15, [#allocation6], %s319_s0, %s319_s0, %s320_s7  }
  0x23   :  { %311 = dma.done.wait [#allocation3], 128  }
  0x24   :  { %312 = vsyncadd [#allocation3], 4294967168 }
  0x25   :  { %313 = dma.done.wait [#allocation6], 2048  }
  0x26   :  { %314 = vsyncadd [#allocation6], 4294965248  ;;  %v321_v0 = vmov 0.0|0.0   ;;  %vm322_vm0 = vmmov 0   ;;  %v323_v1 = vmov 0.0   ;;  %v43_v2 = vld [vmem:[#allocation5] sm:$0xff] }
  0x27   :  { %211 = vmatprep.subr.bf16.mxu0 %v321_v0  ;;  %208 = vmatprep.mubr.msk.f32.mxu0 %vm322_vm0, %v323_v1  ;;  %v44_v3 = vld [vmem:[#allocation5 + $0x8] sm:$0xff]  ;;  %v45_v4 = vld [vmem:[#allocation5 + $0x10] sm:$0xff]  ;;  %v46_v6 = vld [vmem:[#allocation5 + $0x18] sm:$0xff]  ;;  %s324_s11 = smov [#allocation7]  }
  0x28   :  { %v212_v5 = vpack.c.bf16 %v44_v3, %v43_v2  ;;  %v215_v7 = vpack.c.bf16 %v46_v6, %v45_v4  ;;  %v47_v8 = vld [vmem:[#allocation5 + $0x20] sm:$0xff]  ;;  %v48_v9 = vld [vmem:[#allocation5 + $0x28] sm:$0xff]  ;;  %v49_v11 = vld [vmem:[#allocation5 + $0x30] sm:$0xff]  ;;  %s148_s12 = sshll.u32 %s324_s11, 4  ;;  %s149_s12 = int_to_ptr.vmem [resolvable:$true] %s148_s12 }
  0x29   :  { %v218_v10 = vpack.c.bf16 %v48_v9, %v47_v8  ;;  %v50_v12 = vld [vmem:[#allocation5 + $0x38] sm:$0xff]  ;;  %v51_v14 = vld [vmem:[#allocation5 + $0x40] sm:$0xff]  ;;  %v52_v15 = vld [vmem:[#allocation5 + $0x48] sm:$0xff]  ;;  %s289_s13 = scalar_lea.vmem %s149_s12, 128  ;;  %p294_p3 = scmp.lt.s32.totalorder %s149_s12, %s149_s12 }
  0x2a   :  { %213 = vmatpush3.bf16.msra.mxu0 %v212_v5  ;;  %v221_v13 = vpack.c.bf16 %v50_v12, %v49_v11  ;;  %v224_v16 = vpack.c.bf16 %v52_v15, %v51_v14  ;;  %v53_v17 = vld [vmem:[#allocation5 + $0x50] sm:$0xff]  ;;  %v54_v18 = vld [vmem:[#allocation5 + $0x58] sm:$0xff]  ;;  %v55_v20 = vld [vmem:[#allocation5 + $0x60] sm:$0xff]  ;;  %p290_p2 = scmp.ne.s32.totalorder %s149_s12, %s289_s13  ;;  %p295_p4 = scmp.lt.s32.totalorder %s289_s13, %s289_s13 }
  0x2b   :  { %214 = vmatprep.subr.bf16.mxu0 %v321_v0  ;;  %v227_v19 = vpack.c.bf16 %v54_v18, %v53_v17  ;;  %v56_v21 = vld [vmem:[#allocation5 + $0x68] sm:$0xff]  ;;  %v57_v23 = vld [vmem:[#allocation5 + $0x70] sm:$0xff]  ;;  %v58_v24 = vld [vmem:[#allocation5 + $0x78] sm:$0xff] }
  0x2c   :  { %v230_v22 = vpack.c.bf16 %v56_v21, %v55_v20  ;;  %v233_v25 = vpack.c.bf16 %v58_v24, %v57_v23  ;;  %v41_v26 = vld [vmem:[#allocation2] sm:$0xff]  ;;  %p296_p5 = por %p295_p4, %p294_p3 }
  0x2d   :  { %v42_v27 = vmul.f32 %v41_v26, %v41_v26  ;;  %v158_v33 = vld [vmem:[%s392_s1] ss:$0 sm:$0xff] }
  0x2e   :  { %216 = vmatpush3.bf16.msra.mxu0 %v215_v7  ;;  %p297_p6 = pnand %p296_p5, %p290_p2 }
  0x2f   :  { %217 = vmatprep.subr.bf16.mxu0 %v321_v0 }
  0x32   :  { %219 = vmatpush3.bf16.msra.mxu0 %v218_v10 }
  0x33   :  { %220 = vmatprep.subr.bf16.mxu0 %v321_v0 }
  0x36   :  { %222 = vmatpush3.bf16.msra.mxu0 %v221_v13 }
  0x37   :  { %223 = vmatprep.subr.bf16.mxu0 %v321_v0 }
  0x3a   :  { %225 = vmatpush3.bf16.msra.mxu0 %v224_v16 }
  0x3b   :  { %226 = vmatprep.subr.bf16.mxu0 %v321_v0 }
  0x3e   :  { %228 = vmatpush3.bf16.msra.mxu0 %v227_v19 }
  0x3f   :  { %229 = vmatprep.subr.bf16.mxu0 %v321_v0 }
  0x42   :  { %231 = vmatpush3.bf16.msra.mxu0 %v230_v22 }
  0x43   :  { %232 = vmatprep.subr.bf16.mxu0 %v321_v0 }
  0x46   :  { %234 = vmatpush3.bf16.msra.mxu0 %v233_v25 }
  0x49   :  { %209 = vmatmul.mubr.f32.vlgmr.msra.gmra.mrb[0].mxu0 %v42_v27 }
 0x11c   :  { %v125_v28 = vpop.f32.mrb[0].mxu0 }
 0x11d   :  { %v129_v29 = vmul.f32 0.03125, %v125_v28  ;;  %v210_v30 = vpop.f32.mrb[1].mxu0 }
 0x11f   :  { %v130_v31 = vadd.f32 1e-05, %v129_v29 }
 0x121   :  { %243 = vrsqrt.f32 %v130_v31 }
 0x12b   :  { %v244_v32 = vpop.eup %243 }
 0x12c   :  { %v132_v34 = vmul.f32 %v244_v32, %v41_v26 }
 0x12e   :  { %v140_v35 = vmul.f32 %v158_v33, %v132_v34 }
 0x130   :  { %141 = vst [vmem:[#allocation7] sm:$0xff] %v140_v35 }
 0x131   :  { %300 = shalt.err (!%p297_p6)
}
 0x132   :  { %s301_s16 = scalar_lea.hbm %s394_s3, 128 }
 0x133   :  { %p302_p7 = scmp.ne.s32.totalorder %s394_s3, %s301_s16  ;;  %p305_p8 = scmp.lt.u32.totalorder %s301_s16, %s394_s3 }
 0x135   :  { %p307_p9 = pnand %p305_p8, %p302_p7 }
 0x137   :  { %310 = shalt.err (!%p307_p9)
}
 0x138   :  { %151 = dma.vmem_to_hbm [thread:$0]  %s149_s12, 128, %s394_s3, [#allocation4]  }
 0x139   :  { %315 = dma.done.wait [#allocation4], 128  }
 0x13a   :  { %316 = vsyncadd [#allocation4], 4294967168 }
 0x13b   :  { %155 = vsyncpa [#allocation3], 1 }
 0x13c   :  { %156 = vsyncpa [#allocation6], 1 }
 0x13d   :  { %157 = vsyncpa [#allocation4], 1 }

</bundles_post_ra>
